<compile_context>
chip_gen: v7x
topology: tpu7x:2x2x1
jax: 0.10.0
libtpu: 0.0.40
codegen_flags: <defaults>
</compile_context>

<pallas_src>
import functools

import jax
import jax.numpy as jnp
from jax.experimental import pallas as pl
from jax.experimental.pallas import tpu as pltpu


# ----------------------------------------------------------------------------
# Pallas kernel: one grid step == one image, block (1, C, HWp) in VMEM
# ----------------------------------------------------------------------------
def _iaff_kernel(
    x_ref, r_ref,
    wl1_ref, bl1_ref, wl2_ref, bl2_ref,          # local_att   (BN folded, bf16 w / f32 b)
    wg1_ref, bg1_ref, wg2_ref, bg2_ref,          # global_att  (BN folded)
    wl21_ref, bl21_ref, wl22_ref, bl22_ref,      # local_att2  (BN folded)
    o_ref,
    *, hw_true,
):
    # Inputs are bf16 (1, C, HWp); upcast to f32 for all elementwise math.
    xf = x_ref[0].astype(jnp.float32)            # (C, HWp)
    rf = r_ref[0].astype(jnp.float32)
    d = xf - rf                                  # reused by both fusion stages
    inv_hw = 1.0 / float(hw_true)                # padded lanes are zero -> sum unaffected

    wl1 = wl1_ref[...]; wl2 = wl2_ref[...]       # (Cout, Cin) bf16, no transposes
    wg1 = wg1_ref[...]; wg2 = wg2_ref[...]
    wl21 = wl21_ref[...]; wl22 = wl22_ref[...]
    bl1 = bl1_ref[...]; bl2 = bl2_ref[...]       # (Cout, 1) f32 — narrow adds, broadcast fuses
    bg1 = bg1_ref[...]; bg2 = bg2_ref[...]
    bl21 = bl21_ref[...]; bl22 = bl22_ref[...]

    def local_branch(z_f32, w1, b1, w2, b2):
        # conv1x1 -> BN -> ReLU -> conv1x1 -> BN  (BN folded; bf16 MXU operands, f32 acc)
        z = z_f32.astype(jnp.bfloat16)
        h = jnp.dot(w1, z, preferred_element_type=jnp.float32) + b1      # (IC, HWp)
        h = jnp.maximum(h, 0.0).astype(jnp.bfloat16)
        return jnp.dot(w2, h, preferred_element_type=jnp.float32) + b2   # (C, HWp)

    def global_branch(z_f32, w1, b1, w2, b2):
        # AdaptiveAvgPool2d(1) -> conv1x1 -> BN -> ReLU -> conv1x1 -> BN
        m = (jnp.sum(z_f32, axis=1, keepdims=True) * inv_hw).astype(jnp.bfloat16)  # (C, 1)
        h = jnp.dot(w1, m, preferred_element_type=jnp.float32) + b1      # (IC, 1)
        h = jnp.maximum(h, 0.0).astype(jnp.bfloat16)
        return jnp.dot(w2, h, preferred_element_type=jnp.float32) + b2   # (C, 1)

    # ---- first fusion stage ----
    xa = xf + rf
    wei = jax.nn.sigmoid(
        local_branch(xa, wl1, bl1, wl2, bl2)
        + global_branch(xa, wg1, bg1, wg2, bg2))          # (C,1) lane-broadcasts into the add
    xi = rf + wei * d

    # ---- second fusion stage (reference forward() reuses global_att) ----
    wei2 = jax.nn.sigmoid(
        local_branch(xi, wl21, bl21, wl22, bl22)
        + global_branch(xi, wg1, bg1, wg2, bg2))
    o_ref[0] = (rf + wei2 * d).astype(o_ref.dtype)


# ----------------------------------------------------------------------------
# Wrapper: BN folding, lane padding, VMEM sizing, pallas_call
# ----------------------------------------------------------------------------
def _fold_bn(w, b, gamma, beta, mean, var, eps=1e-5):
    """Fold eval-mode BatchNorm into a (Cout, Cin) 1x1-conv weight / bias."""
    s = gamma / jnp.sqrt(var + eps)              # (Cout,)
    w_f = (w * s[:, None]).astype(jnp.float32)
    b_f = (b * s + (beta - mean * s)).astype(jnp.float32)
    return w_f, b_f


def _vmem_capacity_bytes():
    try:
        return int(pltpu.get_tpu_info().vmem_capacity_bytes)
    except Exception:
        return 128 * 1024 * 1024                 # conservative fallback


def iaff_forward(x_nchw, res_nchw, params, *, io_dtype=jnp.bfloat16):
    B, C, H, W = x_nchw.shape
    HW = H * W
    HWp = ((HW + 127) // 128) * 128              # lane-dense last dim

    # NCHW -> (B, C, HW): pure reshape (no transpose), bf16 I/O.
    x = x_nchw.reshape(B, C, HW).astype(io_dtype)
    r = res_nchw.reshape(B, C, HW).astype(io_dtype)
    if HWp != HW:
        pad = ((0, 0), (0, 0), (0, HWp - HW))
        x_p = jnp.pad(x, pad)
        r_p = jnp.pad(r, pad)
    else:
        x_p, r_p = x, r

    # Fold BN into each conv of each branch; kernel gets bf16 weights / f32 biases.
    folded_f32 = []                              # f32 copies for the pure-JAX reference
    kernel_args = []
    for branch in ("local", "global", "local2"):
        p = params[branch]
        w1, b1 = _fold_bn(p["w1"], p["b1"], p["g1"], p["be1"], p["m1"], p["v1"])
        w2, b2 = _fold_bn(p["w2"], p["b2"], p["g2"], p["be2"], p["m2"], p["v2"])
        folded_f32 += [w1, b1.reshape(-1, 1), w2, b2.reshape(-1, 1)]
        kernel_args += [w1.astype(jnp.bfloat16), b1.reshape(-1, 1),
                        w2.astype(jnp.bfloat16), b2.reshape(-1, 1)]
    IC = kernel_args[0].shape[0]

    # --- VMEM sizing (per grid step == one image) ---------------------------
    io_bytes = jnp.dtype(io_dtype).itemsize
    per_step = (3 * 2 * C * HWp * io_bytes       # x, r, out blocks (double-buffered)
                + 6 * C * HWp * 4                # live f32 temporaries (d, xa/xi, wei, conv outs)
                + 2 * C * HWp * 2                # bf16 matmul-operand copies
                + 4 * C * IC * 2 + 4 * (C + IC) * 4)   # weights / biases
    budget = _vmem_capacity_bytes() // 2         # ~50% of physical VMEM (32 MiB on v7x)
    if per_step > budget:
        # TODO(synk): for very large H*W (esp. v7x's 64 MiB VMEM) add a second grid
        # axis tiling HW and carry the stage-2 global mean with a two-pass /
        # running-sum scheme instead of whole-image blocks.
        pass
    vmem_limit = int(min(budget, max(int(1.5 * per_step), 16 * 1024 * 1024)))

    # Constant-index_map specs for the 12 tiny weight/bias arrays (all 2-D):
    # their block index never changes, so their DMAs are not re-issued per step.
    w_specs = [pl.BlockSpec(a.shape, lambda i: (0, 0)) for a in kernel_args]

    out_p = pl.pallas_call(
        functools.partial(_iaff_kernel, hw_true=HW),
        out_shape=jax.ShapeDtypeStruct((B, C, HWp), io_dtype),
        grid_spec=pltpu.PrefetchScalarGridSpec(
            num_scalar_prefetch=0,
            grid=(B,),                            # one image per step -> pipelined DMA +
            in_specs=[                            # megacore / 2-TC sharding over batch
                pl.BlockSpec((1, C, HWp), lambda i: (i, 0, 0)),
                pl.BlockSpec((1, C, HWp), lambda i: (i, 0, 0)),
                *w_specs,
            ],
            out_specs=pl.BlockSpec((1, C, HWp), lambda i: (i, 0, 0)),
        ),
        compiler_params=pltpu.CompilerParams(
            dimension_semantics=("parallel",),
            vmem_limit_bytes=vmem_limit),
    )(x_p, r_p, *kernel_args)

    out = out_p[:, :, :HW]                        # drop lane padding
    return out.reshape(B, C, H, W), (x, r, folded_f32)


# ----------------------------------------------------------------------------
# Pure-JAX reference (same folded params, f32 math, same bf16-cast inputs)
# ----------------------------------------------------------------------------
def _reference(x, r, folded):
    (wl1, bl1, wl2, bl2,
     wg1, bg1, wg2, bg2,
     wl21, bl21, wl22, bl22) = folded
    xf = x.astype(jnp.float32)
    rf = r.astype(jnp.float32)

    def local(z, w1, b1, w2, b2):
        h = jnp.maximum(jnp.einsum('oc,bcs->bos', w1, z) + b1[None], 0.0)
        return jnp.einsum('co,bos->bcs', w2, h) + b2[None]

    def glob(z, w1, b1, w2, b2):
        m = jnp.mean(z, axis=2, keepdims=True)
        h = jnp.maximum(jnp.einsum('oc,bcs->bos', w1, m) + b1[None], 0.0)
        return jnp.einsum('co,bos->bcs', w2, h) + b2[None]

    xa = xf + rf
    wei = jax.nn.sigmoid(local(xa, wl1, bl1, wl2, bl2)
                         + glob(xa, wg1, bg1, wg2, bg2))
    xi = rf + wei * (xf - rf)
    wei2 = jax.nn.sigmoid(local(xi, wl21, bl21, wl22, bl22)
                          + glob(xi, wg1, bg1, wg2, bg2))
    return rf + wei2 * (xf - rf)


# ----------------------------------------------------------------------------
# Deterministic synthetic parameters (PyTorch conv layout: (Cout, Cin))
# ----------------------------------------------------------------------------
def make_params(key, channels=64, r=4):
    ic = channels // r
    params = {}
    for i, branch in enumerate(("local", "global", "local2")):
        ks = jax.random.split(jax.random.fold_in(key, i), 12)
        params[branch] = dict(
            # conv1: (Cout, Cin) = (inter, channels)
            w1=0.05 * jax.random.normal(ks[0], (ic, channels), jnp.float32),
            b1=0.05 * jax.random.normal(ks[1], (ic,), jnp.float32),
            g1=jax.random.uniform(ks[2], (ic,), jnp.float32, 0.5, 1.5),
            be1=0.05 * jax.random.normal(ks[3], (ic,), jnp.float32),
            m1=0.05 * jax.random.normal(ks[4], (ic,), jnp.float32),
            v1=jax.random.uniform(ks[5], (ic,), jnp.float32, 0.5, 1.5),
            # conv2: (Cout, Cin) = (channels, inter)
            w2=0.05 * jax.random.normal(ks[6], (channels, ic), jnp.float32),
            b2=0.05 * jax.random.normal(ks[7], (channels,), jnp.float32),
            g2=jax.random.uniform(ks[8], (channels,), jnp.float32, 0.5, 1.5),
            be2=0.05 * jax.random.normal(ks[9], (channels,), jnp.float32),
            m2=0.05 * jax.random.normal(ks[10], (channels,), jnp.float32),
            v2=jax.random.uniform(ks[11], (channels,), jnp.float32, 0.5, 1.5),
        )
    # global_att2 exists in the module but is never used by forward() — omitted.
    return params


if __name__ == "__main__":
    key = jax.random.PRNGKey(0)
    k_x, k_r, k_p = jax.random.split(key, 3)

    B, C, H, W = 2, 64, 8, 8
    x = jax.random.normal(k_x, (B, C, H, W), jnp.float32)
    residual = jax.random.normal(k_r, (B, C, H, W), jnp.float32)
    params = make_params(k_p, channels=C, r=4)

    out_nchw, (x_flat, r_flat, folded) = iaff_forward(x, residual, params)
    out_nchw = jax.block_until_ready(out_nchw)

    # Verify against the pure-JAX reference (same bf16 inputs, f32 compute).
    ref_nchw = _reference(x_flat, r_flat, folded).reshape(B, C, H, W)
    err = float(jnp.max(jnp.abs(out_nchw.astype(jnp.float32) - ref_nchw)))
    assert err < 5e-2, err

    print("KERNEL_OK")
</pallas_src>

<mosaic_0001>
module attributes {stable_mosaic.version = 11 : i64} {
  func.func @_iaff_kernel(%arg0: i32, %arg1: memref<1x64x128xbf16, #tpu.memory_space<vmem>>, %arg2: memref<1x64x128xbf16, #tpu.memory_space<vmem>>, %arg3: memref<16x64xbf16, #tpu.memory_space<vmem>>, %arg4: memref<16x1xf32, #tpu.memory_space<vmem>>, %arg5: memref<64x16xbf16, #tpu.memory_space<vmem>>, %arg6: memref<64x1xf32, #tpu.memory_space<vmem>>, %arg7: memref<16x64xbf16, #tpu.memory_space<vmem>>, %arg8: memref<16x1xf32, #tpu.memory_space<vmem>>, %arg9: memref<64x16xbf16, #tpu.memory_space<vmem>>, %arg10: memref<64x1xf32, #tpu.memory_space<vmem>>, %arg11: memref<16x64xbf16, #tpu.memory_space<vmem>>, %arg12: memref<16x1xf32, #tpu.memory_space<vmem>>, %arg13: memref<64x16xbf16, #tpu.memory_space<vmem>>, %arg14: memref<64x1xf32, #tpu.memory_space<vmem>>, %arg15: memref<1x64x128xbf16, #tpu.memory_space<vmem>>) attributes {dimension_semantics = [#tpu.dimension_semantics<parallel>], iteration_bounds = array<i64: 2>, scalar_prefetch = 0 : i64, scratch_operands = 0 : i64, tpu.core_type = #tpu.core_type<tc>, window_params = [{transform_indices = @transform_0, window_bounds = array<i64: 1, 64, 128>}, {transform_indices = @transform_1, window_bounds = array<i64: 1, 64, 128>}, {pipeline_mode = #tpu.pipeline_mode<synchronous>, transform_indices = @transform_2, window_bounds = array<i64: 16, 64>}, {pipeline_mode = #tpu.pipeline_mode<synchronous>, transform_indices = @transform_3, window_bounds = array<i64: 16, 1>}, {pipeline_mode = #tpu.pipeline_mode<synchronous>, transform_indices = @transform_4, window_bounds = array<i64: 64, 16>}, {pipeline_mode = #tpu.pipeline_mode<synchronous>, transform_indices = @transform_5, window_bounds = array<i64: 64, 1>}, {pipeline_mode = #tpu.pipeline_mode<synchronous>, transform_indices = @transform_6, window_bounds = array<i64: 16, 64>}, {pipeline_mode = #tpu.pipeline_mode<synchronous>, transform_indices = @transform_7, window_bounds = array<i64: 16, 1>}, {pipeline_mode = #tpu.pipeline_mode<synchronous>, transform_indices = @transform_8, window_bounds = array<i64: 64, 16>}, {pipeline_mode = #tpu.pipeline_mode<synchronous>, transform_indices = @transform_9, window_bounds = array<i64: 64, 1>}, {pipeline_mode = #tpu.pipeline_mode<synchronous>, transform_indices = @transform_10, window_bounds = array<i64: 16, 64>}, {pipeline_mode = #tpu.pipeline_mode<synchronous>, transform_indices = @transform_11, window_bounds = array<i64: 16, 1>}, {pipeline_mode = #tpu.pipeline_mode<synchronous>, transform_indices = @transform_12, window_bounds = array<i64: 64, 16>}, {pipeline_mode = #tpu.pipeline_mode<synchronous>, transform_indices = @transform_13, window_bounds = array<i64: 64, 1>}, {transform_indices = @transform_14, window_bounds = array<i64: 1, 64, 128>}]} {
    %c0 = arith.constant 0 : index
    %c0_0 = arith.constant 0 : index
    %c0_1 = arith.constant 0 : index
    %0 = vector.load %arg1[%c0, %c0_0, %c0_1] : memref<1x64x128xbf16, #tpu.memory_space<vmem>>, vector<1x64x128xbf16>
    %1 = vector.shape_cast %0 : vector<1x64x128xbf16> to vector<64x128xbf16>
    %2 = arith.extf %1 : vector<64x128xbf16> to vector<64x128xf32>
    %c0_2 = arith.constant 0 : index
    %c0_3 = arith.constant 0 : index
    %c0_4 = arith.constant 0 : index
    %3 = vector.load %arg2[%c0_2, %c0_3, %c0_4] : memref<1x64x128xbf16, #tpu.memory_space<vmem>>, vector<1x64x128xbf16>
    %4 = vector.shape_cast %3 : vector<1x64x128xbf16> to vector<64x128xbf16>
    %5 = arith.extf %4 : vector<64x128xbf16> to vector<64x128xf32>
    %6 = arith.subf %2, %5 : vector<64x128xf32>
    %c0_5 = arith.constant 0 : index
    %c0_6 = arith.constant 0 : index
    %7 = vector.load %arg3[%c0_5, %c0_6] : memref<16x64xbf16, #tpu.memory_space<vmem>>, vector<16x64xbf16>
    %c0_7 = arith.constant 0 : index
    %c0_8 = arith.constant 0 : index
    %8 = vector.load %arg5[%c0_7, %c0_8] : memref<64x16xbf16, #tpu.memory_space<vmem>>, vector<64x16xbf16>
    %c0_9 = arith.constant 0 : index
    %c0_10 = arith.constant 0 : index
    %9 = vector.load %arg7[%c0_9, %c0_10] : memref<16x64xbf16, #tpu.memory_space<vmem>>, vector<16x64xbf16>
    %c0_11 = arith.constant 0 : index
    %c0_12 = arith.constant 0 : index
    %10 = vector.load %arg9[%c0_11, %c0_12] : memref<64x16xbf16, #tpu.memory_space<vmem>>, vector<64x16xbf16>
    %c0_13 = arith.constant 0 : index
    %c0_14 = arith.constant 0 : index
    %11 = vector.load %arg11[%c0_13, %c0_14] : memref<16x64xbf16, #tpu.memory_space<vmem>>, vector<16x64xbf16>
    %c0_15 = arith.constant 0 : index
    %c0_16 = arith.constant 0 : index
    %12 = vector.load %arg13[%c0_15, %c0_16] : memref<64x16xbf16, #tpu.memory_space<vmem>>, vector<64x16xbf16>
    %c0_17 = arith.constant 0 : index
    %c0_18 = arith.constant 0 : index
    %13 = vector.load %arg4[%c0_17, %c0_18] : memref<16x1xf32, #tpu.memory_space<vmem>>, vector<16x1xf32>
    %c0_19 = arith.constant 0 : index
    %c0_20 = arith.constant 0 : index
    %14 = vector.load %arg6[%c0_19, %c0_20] : memref<64x1xf32, #tpu.memory_space<vmem>>, vector<64x1xf32>
    %c0_21 = arith.constant 0 : index
    %c0_22 = arith.constant 0 : index
    %15 = vector.load %arg8[%c0_21, %c0_22] : memref<16x1xf32, #tpu.memory_space<vmem>>, vector<16x1xf32>
    %c0_23 = arith.constant 0 : index
    %c0_24 = arith.constant 0 : index
    %16 = vector.load %arg10[%c0_23, %c0_24] : memref<64x1xf32, #tpu.memory_space<vmem>>, vector<64x1xf32>
    %c0_25 = arith.constant 0 : index
    %c0_26 = arith.constant 0 : index
    %17 = vector.load %arg12[%c0_25, %c0_26] : memref<16x1xf32, #tpu.memory_space<vmem>>, vector<16x1xf32>
    %c0_27 = arith.constant 0 : index
    %c0_28 = arith.constant 0 : index
    %18 = vector.load %arg14[%c0_27, %c0_28] : memref<64x1xf32, #tpu.memory_space<vmem>>, vector<64x1xf32>
    %19 = arith.addf %2, %5 : vector<64x128xf32>
    %20 = arith.truncf %19 : vector<64x128xf32> to vector<64x128xbf16>
    %cst = arith.constant dense<0.000000e+00> : vector<16x128xf32>
    %21 = tpu.matmul %7, %20, %cst {dimension_numbers = #tpu.dot_dimension_numbers<[1], [0], [0], [1], [0, 0, 1, 1], [], []>} : vector<16x64xbf16>, vector<64x128xbf16>, vector<16x128xf32> -> vector<16x128xf32>
    %22 = vector.broadcast %13 : vector<16x1xf32> to vector<16x128xf32>
    %23 = arith.addf %21, %22 : vector<16x128xf32>
    %cst_29 = arith.constant 0.000000e+00 : f32
    %24 = vector.broadcast %cst_29 : f32 to vector<16x128xf32>
    %25 = arith.maximumf %23, %24 : vector<16x128xf32>
    %26 = arith.truncf %25 : vector<16x128xf32> to vector<16x128xbf16>
    %cst_30 = arith.constant dense<0.000000e+00> : vector<64x128xf32>
    %27 = tpu.matmul %8, %26, %cst_30 {dimension_numbers = #tpu.dot_dimension_numbers<[1], [0], [0], [1], [0, 0, 1, 1], [], []>} : vector<64x16xbf16>, vector<16x128xbf16>, vector<64x128xf32> -> vector<64x128xf32>
    %28 = vector.broadcast %14 : vector<64x1xf32> to vector<64x128xf32>
    %29 = arith.addf %27, %28 : vector<64x128xf32>
    %cst_31 = arith.constant dense<0.000000e+00> : vector<64xf32>
    %30 = vector.multi_reduction <add>, %19, %cst_31 [1] : vector<64x128xf32> to vector<64xf32>
    %31 = vector.shape_cast %30 : vector<64xf32> to vector<64x1xf32>
    %cst_32 = arith.constant 1.562500e-02 : f32
    %32 = vector.broadcast %cst_32 : f32 to vector<64x1xf32>
    %33 = arith.mulf %31, %32 : vector<64x1xf32>
    %34 = arith.truncf %33 : vector<64x1xf32> to vector<64x1xbf16>
    %cst_33 = arith.constant dense<0.000000e+00> : vector<16x1xf32>
    %35 = tpu.matmul %9, %34, %cst_33 {dimension_numbers = #tpu.dot_dimension_numbers<[1], [0], [0], [1], [0, 0, 1, 1], [], []>} : vector<16x64xbf16>, vector<64x1xbf16>, vector<16x1xf32> -> vector<16x1xf32>
    %36 = arith.addf %35, %15 : vector<16x1xf32>
    %cst_34 = arith.constant 0.000000e+00 : f32
    %37 = vector.broadcast %cst_34 : f32 to vector<16x1xf32>
    %38 = arith.maximumf %36, %37 : vector<16x1xf32>
    %39 = arith.truncf %38 : vector<16x1xf32> to vector<16x1xbf16>
    %cst_35 = arith.constant dense<0.000000e+00> : vector<64x1xf32>
    %40 = tpu.matmul %10, %39, %cst_35 {dimension_numbers = #tpu.dot_dimension_numbers<[1], [0], [0], [1], [0, 0, 1, 1], [], []>} : vector<64x16xbf16>, vector<16x1xbf16>, vector<64x1xf32> -> vector<64x1xf32>
    %41 = arith.addf %40, %16 : vector<64x1xf32>
    %42 = vector.broadcast %41 : vector<64x1xf32> to vector<64x128xf32>
    %43 = arith.addf %29, %42 : vector<64x128xf32>
    %44 = arith.negf %43 : vector<64x128xf32>
    %45 = math.exp %44 : vector<64x128xf32>
    %cst_36 = arith.constant 1.000000e+00 : f32
    %46 = vector.broadcast %cst_36 : f32 to vector<64x128xf32>
    %47 = arith.addf %46, %45 : vector<64x128xf32>
    %48 = arith.divf %46, %47 : vector<64x128xf32>
    %49 = arith.mulf %48, %6 : vector<64x128xf32>
    %50 = arith.addf %5, %49 : vector<64x128xf32>
    %51 = arith.truncf %50 : vector<64x128xf32> to vector<64x128xbf16>
    %cst_37 = arith.constant dense<0.000000e+00> : vector<16x128xf32>
    %52 = tpu.matmul %11, %51, %cst_37 {dimension_numbers = #tpu.dot_dimension_numbers<[1], [0], [0], [1], [0, 0, 1, 1], [], []>} : vector<16x64xbf16>, vector<64x128xbf16>, vector<16x128xf32> -> vector<16x128xf32>
    %53 = vector.broadcast %17 : vector<16x1xf32> to vector<16x128xf32>
    %54 = arith.addf %52, %53 : vector<16x128xf32>
    %cst_38 = arith.constant 0.000000e+00 : f32
    %55 = vector.broadcast %cst_38 : f32 to vector<16x128xf32>
    %56 = arith.maximumf %54, %55 : vector<16x128xf32>
    %57 = arith.truncf %56 : vector<16x128xf32> to vector<16x128xbf16>
    %cst_39 = arith.constant dense<0.000000e+00> : vector<64x128xf32>
    %58 = tpu.matmul %12, %57, %cst_39 {dimension_numbers = #tpu.dot_dimension_numbers<[1], [0], [0], [1], [0, 0, 1, 1], [], []>} : vector<64x16xbf16>, vector<16x128xbf16>, vector<64x128xf32> -> vector<64x128xf32>
    %59 = vector.broadcast %18 : vector<64x1xf32> to vector<64x128xf32>
    %60 = arith.addf %58, %59 : vector<64x128xf32>
    %cst_40 = arith.constant dense<0.000000e+00> : vector<64xf32>
    %61 = vector.multi_reduction <add>, %50, %cst_40 [1] : vector<64x128xf32> to vector<64xf32>
    %62 = vector.shape_cast %61 : vector<64xf32> to vector<64x1xf32>
    %cst_41 = arith.constant 1.562500e-02 : f32
    %63 = vector.broadcast %cst_41 : f32 to vector<64x1xf32>
    %64 = arith.mulf %62, %63 : vector<64x1xf32>
    %65 = arith.truncf %64 : vector<64x1xf32> to vector<64x1xbf16>
    %cst_42 = arith.constant dense<0.000000e+00> : vector<16x1xf32>
    %66 = tpu.matmul %9, %65, %cst_42 {dimension_numbers = #tpu.dot_dimension_numbers<[1], [0], [0], [1], [0, 0, 1, 1], [], []>} : vector<16x64xbf16>, vector<64x1xbf16>, vector<16x1xf32> -> vector<16x1xf32>
    %67 = arith.addf %66, %15 : vector<16x1xf32>
    %cst_43 = arith.constant 0.000000e+00 : f32
    %68 = vector.broadcast %cst_43 : f32 to vector<16x1xf32>
    %69 = arith.maximumf %67, %68 : vector<16x1xf32>
    %70 = arith.truncf %69 : vector<16x1xf32> to vector<16x1xbf16>
    %cst_44 = arith.constant dense<0.000000e+00> : vector<64x1xf32>
    %71 = tpu.matmul %10, %70, %cst_44 {dimension_numbers = #tpu.dot_dimension_numbers<[1], [0], [0], [1], [0, 0, 1, 1], [], []>} : vector<64x16xbf16>, vector<16x1xbf16>, vector<64x1xf32> -> vector<64x1xf32>
    %72 = arith.addf %71, %16 : vector<64x1xf32>
    %73 = vector.broadcast %72 : vector<64x1xf32> to vector<64x128xf32>
    %74 = arith.addf %60, %73 : vector<64x128xf32>
    %75 = arith.negf %74 : vector<64x128xf32>
    %76 = math.exp %75 : vector<64x128xf32>
    %cst_45 = arith.constant 1.000000e+00 : f32
    %77 = vector.broadcast %cst_45 : f32 to vector<64x128xf32>
    %78 = arith.addf %77, %76 : vector<64x128xf32>
    %79 = arith.divf %77, %78 : vector<64x128xf32>
    %80 = arith.mulf %79, %6 : vector<64x128xf32>
    %81 = arith.addf %5, %80 : vector<64x128xf32>
    %82 = arith.truncf %81 : vector<64x128xf32> to vector<64x128xbf16>
    %c0_46 = arith.constant 0 : index
    %c0_47 = arith.constant 0 : index
    %c0_48 = arith.constant 0 : index
    %83 = vector.load %arg15[%c0_46, %c0_47, %c0_48] : memref<1x64x128xbf16, #tpu.memory_space<vmem>>, vector<1x64x128xbf16>
    %84 = vector.shape_cast %83 : vector<1x64x128xbf16> to vector<64x128xbf16>
    %85 = vector.shape_cast %82 : vector<64x128xbf16> to vector<1x64x128xbf16>
    tpu.vector_store %arg15[%c0_46, %c0_47, %c0_48], %85 {strides = array<i32>} : memref<1x64x128xbf16, #tpu.memory_space<vmem>>, vector<1x64x128xbf16>,
    return
  }
  func.func @transform_0(%arg0: i32) -> (i32, i32, i32) {
    %c0_i32 = arith.constant 0 : i32
    %c0_i32_0 = arith.constant 0 : i32
    %c0_i32_1 = arith.constant 0 : i32
    return %arg0, %c0_i32, %c0_i32_0 : i32, i32, i32
  }
  func.func @transform_1(%arg0: i32) -> (i32, i32, i32) {
    %c0_i32 = arith.constant 0 : i32
    %c0_i32_0 = arith.constant 0 : i32
    %c0_i32_1 = arith.constant 0 : i32
    return %arg0, %c0_i32, %c0_i32_0 : i32, i32, i32
  }
  func.func @transform_2(%arg0: i32) -> (i32, i32) {
    %c0_i32 = arith.constant 0 : i32
    %c0_i32_0 = arith.constant 0 : i32
    %c0_i32_1 = arith.constant 0 : i32
    return %c0_i32, %c0_i32_0 : i32, i32
  }
  func.func @transform_3(%arg0: i32) -> (i32, i32) {
    %c0_i32 = arith.constant 0 : i32
    %c0_i32_0 = arith.constant 0 : i32
    %c0_i32_1 = arith.constant 0 : i32
    return %c0_i32, %c0_i32_0 : i32, i32
  }
  func.func @transform_4(%arg0: i32) -> (i32, i32) {
    %c0_i32 = arith.constant 0 : i32
    %c0_i32_0 = arith.constant 0 : i32
    %c0_i32_1 = arith.constant 0 : i32
    return %c0_i32, %c0_i32_0 : i32, i32
  }
  func.func @transform_5(%arg0: i32) -> (i32, i32) {
    %c0_i32 = arith.constant 0 : i32
    %c0_i32_0 = arith.constant 0 : i32
    %c0_i32_1 = arith.constant 0 : i32
    return %c0_i32, %c0_i32_0 : i32, i32
  }
  func.func @transform_6(%arg0: i32) -> (i32, i32) {
    %c0_i32 = arith.constant 0 : i32
    %c0_i32_0 = arith.constant 0 : i32
    %c0_i32_1 = arith.constant 0 : i32
    return %c0_i32, %c0_i32_0 : i32, i32
  }
  func.func @transform_7(%arg0: i32) -> (i32, i32) {
    %c0_i32 = arith.constant 0 : i32
    %c0_i32_0 = arith.constant 0 : i32
    %c0_i32_1 = arith.constant 0 : i32
    return %c0_i32, %c0_i32_0 : i32, i32
  }
  func.func @transform_8(%arg0: i32) -> (i32, i32) {
    %c0_i32 = arith.constant 0 : i32
    %c0_i32_0 = arith.constant 0 : i32
    %c0_i32_1 = arith.constant 0 : i32
    return %c0_i32, %c0_i32_0 : i32, i32
  }
  func.func @transform_9(%arg0: i32) -> (i32, i32) {
    %c0_i32 = arith.constant 0 : i32
    %c0_i32_0 = arith.constant 0 : i32
    %c0_i32_1 = arith.constant 0 : i32
    return %c0_i32, %c0_i32_0 : i32, i32
  }
  func.func @transform_10(%arg0: i32) -> (i32, i32) {
    %c0_i32 = arith.constant 0 : i32
    %c0_i32_0 = arith.constant 0 : i32
    %c0_i32_1 = arith.constant 0 : i32
    return %c0_i32, %c0_i32_0 : i32, i32
  }
  func.func @transform_11(%arg0: i32) -> (i32, i32) {
    %c0_i32 = arith.constant 0 : i32
    %c0_i32_0 = arith.constant 0 : i32
    %c0_i32_1 = arith.constant 0 : i32
    return %c0_i32, %c0_i32_0 : i32, i32
  }
  func.func @transform_12(%arg0: i32) -> (i32, i32) {
    %c0_i32 = arith.constant 0 : i32
    %c0_i32_0 = arith.constant 0 : i32
    %c0_i32_1 = arith.constant 0 : i32
    return %c0_i32, %c0_i32_0 : i32, i32
  }
  func.func @transform_13(%arg0: i32) -> (i32, i32) {
    %c0_i32 = arith.constant 0 : i32
    %c0_i32_0 = arith.constant 0 : i32
    %c0_i32_1 = arith.constant 0 : i32
    return %c0_i32, %c0_i32_0 : i32, i32
  }
  func.func @transform_14(%arg0: i32) -> (i32, i32, i32) {
    %c0_i32 = arith.constant 0 : i32
    %c0_i32_0 = arith.constant 0 : i32
    %c0_i32_1 = arith.constant 0 : i32
    return %arg0, %c0_i32, %c0_i32_0 : i32, i32, i32
  }
}

</mosaic_0001>

<bundles_post_ra>
// kernel: tpu_custom_call.1
= control target key start
LH: loop header
LB: loop body
LE: loop exit
PB: predicated region body
PF: predicated region fallthrough
CT: control target
= control target key end

     0   :  { %19 = vsyncpa [#allocation3], 0  ;;  %s2727_s0 = inlined_call_operand.vmem [shape: bf16[2,64,128], index: 0, kind: input, shape index: {}]   ;;  %s2728_s1 = inlined_call_operand.vmem [shape: bf16[2,64,128], index: 1, kind: input, shape index: {}]   ;;  %s2729_s2 = inlined_call_operand.vmem [shape: bf16[16,64], index: 2, kind: input, shape index: {}]   ;;  %s2730_s3 = inlined_call_operand.vmem [shape: f32[16,1], index: 3, kind: input, shape index: {}]   ;;  %s2731_s4 = inlined_call_operand.vmem [shape: bf16[64,16], index: 4, kind: input, shape index: {}]   ;;  %s2732_s5 = inlined_call_operand.vmem [shape: f32[64,1], index: 5, kind: input, shape index: {}]   ;;  %s2733_s6 = inlined_call_operand.vmem [shape: bf16[16,64], index: 6, kind: input, shape index: {}]   ;;  %s2734_s7 = inlined_call_operand.vmem [shape: f32[16,1], index: 7, kind: input, shape index: {}]   ;;  %s2735_s8 = inlined_call_operand.vmem [shape: bf16[64,16], index: 8, kind: input, shape index: {}]   ;;  %s2736_s9 = inlined_call_operand.vmem [shape: f32[64,1], index: 9, kind: input, shape index: {}]   ;;  %s2737_s10 = inlined_call_operand.vmem [shape: bf16[16,64], index: 10, kind: input, shape index: {}]   ;;  %s2738_s11 = inlined_call_operand.vmem [shape: f32[16,1], index: 11, kind: input, shape index: {}]   ;;  %s2739_s12 = inlined_call_operand.vmem [shape: bf16[64,16], index: 12, kind: input, shape index: {}]   ;;  %s2740_s13 = inlined_call_operand.vmem [shape: f32[64,1], index: 13, kind: input, shape index: {}]   ;;  %s2741_s14 = inlined_call_operand.hbm [shape: bf16[2,64,128], index: 14, kind: output, shape index: {}]  }
   0x1   :  { %21 = vsyncpa [#allocation3 + $0x1], 0  ;;  %s2214_s29 = smov 0   ;;  %s2216_s30 = smov 0  }
   0x2   :  { %s2218_s15 = smov 0   ;;  %s2220_s16 = smov 0  }
   0x3 LB: > { %2746 = sst [smem:[#allocation5_spill]] %s2127_s15  ;;  %s2235_s17 = sadd.s32 4294967295, %s2131_s16   ;;  %s2131_s16 = sphi %s2220_s16, %s2752_s16   ;;  %s2127_s15 = sphi %s2218_s15, %s2754_s15   ;;  %s2123_s30 = sphi %s2216_s30, %s2756_s30   ;;  %s2119_s29 = sphi %s2214_s29, %s2755_s29  }
   0x4   : > { %s1669_s18 = sadd.s32 4294967294, %s2131_s16   ;;  %s2239_s19 = sadd.s32 1, %s2131_s16  }
   0x5   : > { %2747 = sst [smem:[#allocation6_spill]] %s2239_s19  ;;  %s338_s20 = sadd.s32 1, %s2127_s15 }
   0x6   : > { %s335_s21 = ssub.s32 %s2131_s16, %s2239_s19  ;;  %p348_p0 = scmp.ne.s32.totalorder %s2127_s15, %s2123_s30 }
   0x7   : > { %p336_p1 = scmp.eq.s32.totalorder %s335_s21, 0  ;;  %p349_p2 = scmp.eq.s32.totalorder %s2235_s17, 1 }
   0x8   : > { %p354_p3 = scmp.ne.s32.totalorder %s2123_s30, %s2119_s29  ;;  %p355_p4 = scmp.eq.s32.totalorder %s1669_s18, 1 }
   0x9   : > { %s2250_s22 = scalar_select %p336_p1, %s2127_s15, %s338_s20  }
   0xa   : > { %p2252_p5 = por %p349_p2, %p348_p0  ;;  %p2256_p6 = por %p355_p4, %p354_p3 }
   0xb   : > { %2748 = sst [smem:[#allocation7_spill]] %s2250_s22  ;;  %p1672_p7 = scmp.ge.s32.totalorder %s2131_s16, 1 }
   0xc   : > { %p425_p8 = scmp.lt.s32.totalorder %s2131_s16, 3 }
   0xe   : > { %p426_p9 = pnand %p1672_p7, %p425_p8 }
   0xf   : > { %v557_v0 = vld [vmem:[%s2730_s3] sm:$0xff] (!%p426_p9)  ;;  %p476_p10 = scmp.lt.s32.totalorder (!%p426_p9), %s2235_s17, 1  ;;  %v2133_v1 = vmov (!%p426_p9), 0   ;;  %v2134_v2 = vmov (!%p426_p9), 0.0   ;;  %v558_v3 = vld [vmem:[%s2730_s3 + $0x8] sm:$0xff] (!%p426_p9)  ;;  %vm2135_vm0 = vmmov (!%p426_p9), 0  }
  0x10   : > { %429 = sbr.rel (%p426_p9) target bundleno = 1784 (0x6f8), region = 76  ;;  %1988 = vset.pattern.permute.xlu0 (!%p426_p9), %v2133_v1  ;;  %1854 = vmatprep.subr.bf16.mxu0 (!%p426_p9), %v2134_v2  ;;  %v1990_v40 = vld [vmem:[%s2729_s2] sm:$0xff] (!%p426_p9)   ;;  %vm614_vm1 = vcmask (!%p426_p9), 523264   ;;  %v560_v41 = vld [vmem:[%s2732_s5 + $0x8] sm:$0xff] (!%p426_p9)  ;;  %v565_v43 = vld [vmem:[%s2732_s5 + $0x30] sm:$0xff] (!%p426_p9)  ;;  %vm722_vm2 = vcmask (!%p426_p9), 130048  }
  0x11   : > { %601 = vperm.xlu0 (!%p426_p9), %1988, %v557_v0   ;;  %1862 = vmatprep.mubr.msk.bf16.mxu0 (!%p426_p9), %vm2135_vm0, %v2134_v2  ;;  %v563_v42 = vld [vmem:[%s2732_s5 + $0x20] sm:$0xff] (!%p426_p9)  ;;  %v561_v46 = vld [vmem:[%s2732_s5 + $0x10] sm:$0xff] (!%p426_p9)  ;;  %v562_v47 = vld [vmem:[%s2732_s5 + $0x18] sm:$0xff] (!%p426_p9)  ;;  %s2136_s18 = smov (!%p426_p9), [#allocation2]  }
  0x12   : > { %1989 = vset.pattern.permute.xlu1 (!%p426_p9), %v2133_v1  ;;  %v1991_v44 = vld [vmem:[%s2731_s4] sm:$0xff] (!%p426_p9)   ;;  %v564_v48 = vld [vmem:[%s2732_s5 + $0x28] sm:$0xff] (!%p426_p9) }
  0x13   : > { %1868 = vmatprep.mubr.msk.bf16.mxu1 (!%p426_p9), %vm722_vm2, %v1991_v44  ;;  %v559_v45 = vld [vmem:[%s2732_s5] sm:$0xff] (!%p426_p9) }
  0x15   : > { %606 = vperm.xlu0 (!%p426_p9), %1988, %v558_v3  }
  0x17   : > { %s477_s27 = scalar_select %p476_p10, %s2235_s17, 1 }
  0x19   : > { %s1742_s20 = sshll.u32 %s477_s27, 5 }
  0x1a   : > { %s480_s26 = scalar_lea.vmem %s2727_s0, %s1742_s20  ;;  %s485_s19 = scalar_lea.vmem %s2728_s1, %s1742_s20 }
  0x1b   : > { %v2279_v4 = vld [vmem:[%s480_s26] sm:$0xff]   ;;  %v2281_v6 = vld [vmem:[%s480_s26 + $0x8] sm:$0xff]   ;;  %v2289_v12 = vld [vmem:[%s480_s26 + $0x10] sm:$0xff]   ;;  %s473_s20 = sand.u32 1, %s2123_s30  }
  0x1c   : > { %v1770_v5 = vld [vmem:[%s485_s19] sm:$0xff]   ;;  %v1755_v7 = vunpack.c.l.bf16 %v2279_v4  ;;  %v1756_v8 = vunpack.c.h.bf16 %v2279_v4  ;;  %v1808_v11 = vld [vmem:[%s485_s19 + $0x8] sm:$0xff]   ;;  %v1809_v13 = vld [vmem:[%s485_s19 + $0x10] sm:$0xff]   ;;  %v1759_v14 = vunpack.c.l.bf16 %v2281_v6  ;;  %v1760_v15 = vunpack.c.h.bf16 %v2281_v6  ;;  %s1673_s21 = sshll.u32 %s473_s20, 5 }
  0x1d   : > { %v2285_v9 = vunpack.c.l.bf16 %v1770_v5  ;;  %v2287_v10 = vunpack.c.h.bf16 %v1770_v5  ;;  %v2293_v16 = vunpack.c.l.bf16 %v1808_v11  ;;  %v2295_v17 = vunpack.c.h.bf16 %v1808_v11  ;;  %v2297_v18 = vld [vmem:[%s480_s26 + $0x18] sm:$0xff]   ;;  %v1992_v5 = vld [vmem:[%s2731_s4 + $0x8] sm:$0xff]   ;;  %v1993_v11 = vld [vmem:[%s2731_s4 + $0x10] sm:$0xff]   ;;  %s475_s25 = scalar_lea.vmem [#allocation2], %s1673_s21  ;;  %s1752_s26 = sshll.u32 %s2235_s17, 9 }
  0x1e   : > { %v1810_v19 = vld [vmem:[%s485_s19 + $0x18] sm:$0xff]   ;;  %v1763_v22 = vunpack.c.l.bf16 %v2289_v12  ;;  %v1764_v23 = vunpack.c.h.bf16 %v2289_v12  ;;  %v2313_v26 = vunpack.c.l.bf16 %v1809_v13  ;;  %v2315_v27 = vunpack.c.h.bf16 %v1809_v13  ;;  %s1595_s15 = sshll.u32 %s475_s25, 4  ;;  %s2680_s27 = scalar_lea.hbm %s2741_s14, %s1752_s26  ;;  %s2682_s15 = int_to_ptr.vmem [resolvable:$true] %s1595_s15 }
  0x1f   : > { %v587_v20 = vadd.f32 %v2285_v9, %v1755_v7  ;;  %v588_v21 = vadd.f32 %v2287_v10, %v1756_v8  ;;  %v589_v24 = vadd.f32 %v2293_v16, %v1759_v14  ;;  %v590_v25 = vadd.f32 %v2295_v17, %v1760_v15  ;;  %s2686_s17 = scalar_lea.sflag [#allocation3], %s473_s20  ;;  %s2069_s28 = scalar_lea.vmem %s2682_s15, 512 }
  0x20   : > { %v1767_v29 = vunpack.c.l.bf16 %v2297_v18  ;;  %v2745_v30 = vunpack.c.h.bf16 %v2297_v18  ;;  %v2319_v31 = vunpack.c.l.bf16 %v1810_v19  ;;  %v591_v33 = vadd.f32 %v2313_v26, %v1763_v22  ;;  %p2070_p11 = scmp.ne.s32.totalorder %s2682_s15, %s2069_s28  ;;  %s2073_s21 = sshll.u32 %s2136_s18, 4  ;;  %s2074_s21 = int_to_ptr.vmem [resolvable:$false] %s2073_s21 }
  0x21   : > { %v595_v28 = vpack.c.bf16 %v588_v21, %v587_v20  ;;  %800 = vadd.xlane.f32.xlu1 %v587_v20  ;;  %v596_v32 = vpack.c.bf16 %v590_v25, %v589_v24  ;;  %v592_v34 = vadd.f32 %v2315_v27, %v1764_v23  ;;  %v2327_v35 = vunpack.c.h.bf16 %v1810_v19  ;;  %s2075_s26 = scalar_lea.vmem %s2074_s21, 1024  ;;  %p2076_p0 = scmp.lt.s32.totalorder %s2682_s15, %s2074_s21 }
  0x22   : > { %v593_v37 = vadd.f32 %v2319_v31, %v1767_v29  ;;  %p2071_p12 = pnand %p2070_p11, %p2252_p5  ;;  %p2077_p1 = scmp.lt.s32.totalorder %s2075_s26, %s2069_s28 }
  0x23   : > { %1855 = vmatpush3.bf16.msra.mxu0 %v595_v28  ;;  %v597_v36 = vpack.c.bf16 %v592_v34, %v591_v33  ;;  %v594_v38 = vadd.f32 %v2327_v35, %v2745_v30 }
  0x24   : > { %1856 = vmatprep.subr.bf16.mxu0 %v2134_v2  ;;  %p2072_p13 = pneg %p2071_p12  ;;  %p2078_p2 = por %p2077_p1, %p2076_p0 }
  0x25   : > { %802 = vadd.xlane.f32.xlu1 %v588_v21  ;;  %v598_v39 = vpack.c.bf16 %v594_v38, %v593_v37 }
  0x26   : > { %p2079_p3 = pnand %p2078_p2, %p2072_p13 }
  0x27   : > { %1857 = vmatpush3.bf16.msra.mxu0 %v596_v32 }
  0x28   : > { %1858 = vmatprep.subr.bf16.mxu0 %v2134_v2 }
  0x29   : > { %806 = vadd.xlane.f32.xlu1 %v590_v25 }
  0x2b   : > { %1859 = vmatpush3.bf16.msra.mxu0 %v597_v36 }
  0x2c   : > { %1860 = vmatprep.subr.bf16.mxu0 %v2134_v2 }
  0x2d   : > { %808 = vadd.xlane.f32.xlu1 %v591_v33 }
  0x2f   : > { %1861 = vmatpush3.bf16.msra.mxu0 %v598_v39 }
  0x31   : > { %810 = vadd.xlane.f32.xlu1 %v592_v34  ;;  %v1994_v34 = vld [vmem:[%s2731_s4 + $0x18] sm:$0xff]  }
  0x32   : > { %1863 = vmatmul.mubr.msk.bf16.vlgmr.msra.gmra.mrb[0].mxu0 %vm614_vm1, %v1990_v40  ;;  %v2388_v40 = vld [vmem:[%s2733_s6] sm:$0xff]  }
  0x34   : > { %804 = vadd.xlane.f32.xlu0 %v589_v24 }
  0x35   : > { %812 = vadd.xlane.f32.xlu1 %v593_v37 }
  0x39   : > { %814 = vadd.xlane.f32.xlu1 %v594_v38 }
  0x4a   : > { %669 = vperm.xlu0 %1988, %v560_v41   ;;  %664 = vperm.xlu1 %1989, %v559_v45   ;;  %v2395_v41 = vld [vmem:[%s2735_s8] sm:$0xff]  }
  0x4e   : > { %684 = vperm.xlu0 %1988, %v563_v42   ;;  %674 = vperm.xlu1 %1989, %v561_v46  }
  0x52   : > { %694 = vperm.xlu0 %1988, %v565_v43   ;;  %679 = vperm.xlu1 %1989, %v562_v47  }
  0x56   : > { %689 = vperm.xlu1 %1989, %v564_v48  }
  0x90   : > { %v602_v52 = vpop.permute.xlu0 %601 }
  0x94   : > { %v607_v57 = vpop.permute.xlu0 %606 }
  0xae   : > { %v801_v49 = vpop.xlane.xlu1 %800 }
  0xaf   : > { %v816_v1 = vmul.f32 0.015625, %v801_v49 }
  0xb2   : > { %v803_v50 = vpop.xlane.xlu1 %802 }
  0xb3   : > { %v817_v3 = vmul.f32 0.015625, %v803_v50  ;;  %v2418_v50 = vld [vmem:[%s2734_s7] sm:$0xff] }
  0xb5   : > { %v824_v21 = vpack.c.bf16 %v817_v3, %v816_v1  ;;  %v2459_v1 = vld [vmem:[%s2736_s9] sm:$0xff] }
  0xb6   : > { %v807_v51 = vpop.xlane.xlu1 %806 }
  0xb7   : > { %v819_v24 = vmul.f32 0.015625, %v807_v51 }
  0xba   : > { %v809_v53 = vpop.xlane.xlu1 %808 }
  0xbb   : > { %v820_v28 = vmul.f32 0.015625, %v809_v53 }
  0xbe   : > { %v811_v63 = vpop.xlane.xlu1 %810 }
  0xbf   : > { %v821_v32 = vmul.f32 0.015625, %v811_v63  ;;  %v2445_v63 = vld [vmem:[%s2735_s8 + $0x18] sm:$0xff]  }
  0xc1   : > { %v805_v13 = vpop.xlane.xlu0 %804  ;;  %v826_v36 = vpack.c.bf16 %v821_v32, %v820_v28  ;;  %v2477_v28 = vld [vmem:[%s2736_s9 + $0x20] sm:$0xff] }
  0xc2   : > { %v813_v19 = vpop.xlane.xlu1 %812  ;;  %v818_v20 = vmul.f32 0.015625, %v805_v13 }
  0xc3   : > { %v822_v37 = vmul.f32 0.015625, %v813_v19 }
  0xc4   : > { %v825_v25 = vpack.c.bf16 %v819_v24, %v818_v20  ;;  %v2466_v20 = vld [vmem:[%s2736_s9 + $0x18] sm:$0xff] }
  0xc6   : > { %v815_v33 = vpop.xlane.xlu1 %814 }
  0xc7   : > { %v823_v38 = vmul.f32 0.015625, %v815_v33  ;;  %v2482_v33 = vld [vmem:[%s2736_s9 + $0x30] sm:$0xff] }
  0xc9   : > { %v827_v39 = vpack.c.bf16 %v823_v38, %v822_v37 }
 0x105   : > { %v652_v54 = vpop.f32.mrb[0].mxu0 }
 0x106   : > { %v653_v55 = vadd.f32 %v652_v54, %v602_v52  ;;  %v1864_v56 = vpop.f32.mrb[1].mxu0  ;;  %v2423_v52 = vld [vmem:[%s2734_s7 + $0x8] sm:$0xff] }
 0x107   : > { %v655_v58 = vpop.f32.mrb[2].mxu0 }
 0x108   : > { %v656_v59 = vadd.f32 %v655_v58, %v607_v57  ;;  %v1865_v60 = vpop.f32.mrb[3].mxu0  ;;  %v659_v61 = vmax.f32 %v653_v55, 0.0 }
 0x10a   : > { %v660_v62 = vmax.f32 %v656_v59, 0.0 }
 0x10c   : > { %v661_v0 = vpack.c.bf16 %v660_v62, %v659_v61  ;;  %v2430_v61 = vld [vmem:[%s2735_s8 + $0x8] sm:$0xff]   ;;  %v2435_v62 = vld [vmem:[%s2735_s8 + $0x10] sm:$0xff]  }
 0x10e   : > { %1866 = vmatprep.subr.bf16.mxu1 %v661_v0 }
 0x10f   : > { %1867 = vmatpush3.bf16.msra.mxu1 %v661_v0  ;;  %v2454_v0 = vld [vmem:[%s2736_s9 + $0x10] sm:$0xff] }
 0x110   : > { %1876 = vmatprep.subr.bf16.mxu1 %v2134_v2 }
 0x112   : > { %1869 = vmatmul.mubr.msk.bf16.vlgmr.msra.gmra.mrb[0].mxu1 %vm722_vm2, %v1992_v5 }
 0x113   : > { %1877 = vmatpush3.bf16.msra.mxu1 %v824_v21  ;;  %1872 = vmatprep.mubr.msk.bf16.mxu1 %vm722_vm2, %v1993_v11 }
 0x114   : > { %1878 = vmatprep.subr.bf16.mxu1 %v2134_v2 }
 0x117   : > { %1879 = vmatpush3.bf16.msra.mxu1 %v825_v25  ;;  %v2472_v25 = vld [vmem:[%s2736_s9 + $0x8] sm:$0xff] }
 0x118   : > { %1880 = vmatprep.subr.bf16.mxu1 %v2134_v2 }
 0x11a   : > { %1873 = vmatmul.mubr.msk.bf16.gmra.mrb[4].mxu1 %vm722_vm2, %v1994_v34 }
 0x11b   : > { %1881 = vmatpush3.bf16.msra.mxu1 %v826_v36  ;;  %1884 = vmatprep.mubr.msk.bf16.mxu1 %vm2135_vm0, %v2134_v2 }
 0x11c   : > { %1882 = vmatprep.subr.bf16.mxu1 %v2134_v2 }
 0x11f   : > { %1883 = vmatpush3.bf16.msra.mxu1 %v827_v39 }
 0x122   : > { %1885 = vmatmul.mubr.msk.bf16.vlgmr.msra.gmra.mrb[8].mxu1 %vm614_vm1, %v2388_v40 }
 0x123   : > { %1890 = vmatprep.mubr.msk.bf16.mxu1 %vm722_vm2, %v2395_v41 }
 0x1e5   : > { %v2399_v42 = vpop.f32.mrb[0].mxu1 }
 0x1e6   : > { %v2401_v43 = vpop.f32.mrb[1].mxu1 }
 0x1e7   : > { %v2403_v44 = vpop.f32.mrb[2].mxu1 }
 0x1e8   : > { %v2405_v45 = vpop.f32.mrb[3].mxu1 }
 0x1ed   : > { %v2407_v46 = vpop.f32.mrb[4].mxu1 }
 0x1ee   : > { %v2409_v47 = vpop.f32.mrb[5].mxu1 }
 0x1ef   : > { %v2411_v48 = vpop.f32.mrb[6].mxu1 }
 0x1f0   : > { %v2413_v49 = vpop.f32.mrb[7].mxu1 }
 0x1f5   : > { %v870_v51 = vpop.f32.mrb[8].mxu1 }
 0x1f6   : > { %v871_v53 = vadd.f32 %v870_v51, %v2418_v50  ;;  %v1886_v54 = vpop.f32.mrb[9].mxu1 }
 0x1f7   : > { %v873_v55 = vpop.f32.mrb[10].mxu1  ;;  %v2493_v54 = vld [vmem:[%s2736_s9 + $0x28] sm:$0xff] }
 0x1f8   : > { %v874_v56 = vadd.f32 %v873_v55, %v2423_v52  ;;  %v1887_v57 = vpop.f32.mrb[11].mxu1  ;;  %v877_v58 = vmax.f32 %v871_v53, 0.0  ;;  %v566_v53 = vld [vmem:[%s2732_s5 + $0x38] sm:$0xff]  ;;  %v577_v55 = vld [vmem:[%s2738_s11] sm:$0xff] }
 0x1f9   : > { %v2502_v57 = vld [vmem:[%s2736_s9 + $0x38] sm:$0xff] }
 0x1fa   : > { %v878_v59 = vmax.f32 %v874_v56, 0.0 }
 0x1fc   : > { %v879_v60 = vpack.c.bf16 %v878_v59, %v877_v58  ;;  %v578_v59 = vld [vmem:[%s2738_s11 + $0x8] sm:$0xff] }
 0x1fe   : > { %1888 = vmatprep.subr.bf16.mxu1 %v879_v60 }
 0x1ff   : > { %1889 = vmatpush3.bf16.msra.mxu1 %v879_v60  ;;  %v665_v60 = vpop.permute.xlu1 %664 }
 0x200   : > { %1898 = vmatprep.subr.bf16.mxu1 %v2134_v2 }
 0x202   : > { %1891 = vmatmul.mubr.msk.bf16.vlgmr.msra.gmra.mrb[12].mxu1 %vm722_vm2, %v2430_v61 }
 0x203   : > { %1894 = vmatprep.mubr.msk.bf16.mxu1 %vm722_vm2, %v2435_v62 }
 0x20a   : > { %1895 = vmatmul.mubr.msk.bf16.gmra.mrb[16].mxu1 %vm722_vm2, %v2445_v63 }
 0x20b   : > { %1906 = vmatprep.mubr.msk.bf16.mxu1 %vm2135_vm0, %v2134_v2 }
 0x2d5   : > { %v1892_v3 = vpop.f32.mrb[12].mxu1 }
 0x2d6   : > { %v955_v5 = vadd.f32 %v1892_v3, %v2454_v0  ;;  %v946_v11 = vpop.f32.mrb[13].mxu1  ;;  %v670_v3 = vpop.permute.xlu0 %669 }
 0x2d7   : > { %v947_v13 = vadd.f32 %v946_v11, %v2459_v1  ;;  %v1893_v19 = vpop.f32.mrb[14].mxu1 }
 0x2d8   : > { %989 = vperm.xlu0 %1988, %v955_v5   ;;  %v949_v21 = vpop.f32.mrb[15].mxu1  ;;  %v958_v24 = vadd.f32 %v1893_v19, %v2466_v20  ;;  %v675_v5 = vpop.permute.xlu1 %674 }
 0x2d9   : > { %979 = vperm.xlu1 %1989, %v947_v13   ;;  %v950_v36 = vadd.f32 %v949_v21, %v2472_v25 }
 0x2da   : > { %v685_v11 = vpop.permute.xlu0 %684 }
 0x2dc   : > { %v680_v13 = vpop.permute.xlu1 %679 }
 0x2dd   : > { %v1896_v32 = vpop.f32.mrb[16].mxu1  ;;  %994 = vperm.xlu1 %1989, %v958_v24   ;;  %v778_v24 = vadd.f32 %v2399_v42, %v675_v5 }
 0x2de   : > { %v962_v34 = vpop.f32.mrb[17].mxu1  ;;  %v971_v51 = vadd.f32 %v1896_v32, %v2482_v33  ;;  %v695_v19 = vpop.permute.xlu0 %694  ;;  %v770_v32 = vadd.f32 %v2401_v43, %v665_v60 }
 0x2df   : > { %v963_v37 = vadd.f32 %v962_v34, %v2477_v28  ;;  %v1897_v38 = vpop.f32.mrb[18].mxu1 }
 0x2e0   : > { %v965_v39 = vpop.f32.mrb[19].mxu1  ;;  %v974_v58 = vadd.f32 %v1897_v38, %v2502_v57  ;;  %v690_v21 = vpop.permute.xlu1 %689 }
 0x2e1   : > { %999 = vperm.xlu0 %1988, %v963_v37   ;;  %984 = vperm.xlu1 %1989, %v950_v36   ;;  %v966_v56 = vadd.f32 %v965_v39, %v2493_v54 }
 0x2e5   : > { %1009 = vperm.xlu0 %1988, %v971_v51   ;;  %699 = vperm.xlu1 %1989, %v566_v53   ;;  %v781_v51 = vadd.f32 %v2403_v44, %v680_v13 }
 0x2e9   : > { %1095 = vperm.xlu0 %1988, %v577_v55   ;;  %1004 = vperm.xlu1 %1989, %v966_v56  }
 0x2ed   : > { %1014 = vperm.xlu1 %1989, %v974_v58   ;;  %v773_v58 = vadd.f32 %v2405_v45, %v670_v3  ;;  %v789_v45 = vadd.f32 %v2413_v49, %v690_v21 }
 0x2f1   : > { %1100 = vperm.xlu1 %1989, %v578_v59   ;;  %v786_v59 = vadd.f32 %v2409_v47, %v685_v11 }
 0x357   : > { %v990_v34 = vpop.permute.xlu0 %989 }
 0x358   : > { %v1019_v36 = vadd.f32 %v990_v34, %v778_v24  ;;  %v980_v37 = vpop.permute.xlu1 %979  ;;  %v794_v24 = vadd.f32 %v2407_v46, %v695_v19 }
 0x359   : > { %v1017_v38 = vadd.f32 %v980_v37, %v770_v32 }
 0x35a   : > { %v1700_v39 = vmul.f32 -1.442695, %v1019_v36 }
 0x35b   : > { %v1698_v53 = vmul.f32 -1.442695, %v1017_v38 }
 0x35c   : > { %2005 = vpow2.f32 %v1700_v39  ;;  %v995_v55 = vpop.permute.xlu1 %994 }
 0x35d   : > { %2007 = vpow2.f32 %v1698_v53  ;;  %v1020_v56 = vadd.f32 %v995_v55, %v781_v51 }
 0x35f   : > { %v1701_v30 = vmul.f32 -1.442695, %v1020_v56 }
 0x360   : > { %v1000_v42 = vpop.permute.xlu0 %999  ;;  %v985_v5 = vpop.permute.xlu1 %984 }
 0x361   : > { %2009 = vpow2.f32 %v1701_v30  ;;  %v1021_v43 = vadd.f32 %v1000_v42, %v786_v59  ;;  %v1018_v60 = vadd.f32 %v985_v5, %v773_v58  ;;  %v2519_v5 = vsub.f32 %v1755_v7, %v2285_v9 }
 0x363   : > { %v1702_v32 = vmul.f32 -1.442695, %v1021_v43  ;;  %v1699_v34 = vmul.f32 -1.442695, %v1018_v60 }
 0x364   : > { %v1010_v44 = vpop.permute.xlu0 %1009  ;;  %v700_v13 = vpop.permute.xlu1 %699 }
 0x365   : > { %2011 = vpow2.f32 %v1702_v32  ;;  %v1023_v36 = vadd.f32 %v1010_v44, %v794_v24  ;;  %v797_v46 = vadd.f32 %v2411_v48, %v700_v13  ;;  %v2524_v48 = vsub.f32 %v1759_v14, %v2293_v16 }
 0x366   : > { %v2006_v37 = vpop.eup %2005  ;;  %2013 = vpow2.f32 %v1699_v34  ;;  %v2530_v34 = vsub.f32 %v1760_v15, %v2295_v17 }
 0x367   : > { %v2008_v38 = vpop.eup %2007  ;;  %v1051_v47 = vadd.f32 1.0, %v2006_v37  ;;  %v1704_v3 = vmul.f32 -1.442695, %v1023_v36 }
 0x368   : > { %v1049_v11 = vadd.f32 1.0, %v2008_v38  ;;  %v1005_v39 = vpop.permute.xlu1 %1004 }
 0x369   : > { %2015 = vrcp.f32 %v1051_v47  ;;  %v1022_v30 = vadd.f32 %v1005_v39, %v789_v45  ;;  %v2538_v45 = vsub.f32 %v1756_v8, %v2287_v10  ;;  %v2545_v39 = vsub.f32 %v1763_v22, %v2313_v26 }
 0x36a   : > { %2017 = vrcp.f32 %v1049_v11  ;;  %v2558_v22 = vsub.f32 %v1764_v23, %v2315_v27 }
 0x36b   : > { %v2010_v51 = vpop.eup %2009  ;;  %2019 = vpow2.f32 %v1704_v3  ;;  %v1703_v19 = vmul.f32 -1.442695, %v1022_v30 }
 0x36c   : > { %v1052_v53 = vadd.f32 1.0, %v2010_v51  ;;  %v1015_v55 = vpop.permute.xlu1 %1014 }
 0x36d   : > { %2021 = vpow2.f32 %v1703_v19  ;;  %v1024_v56 = vadd.f32 %v1015_v55, %v797_v46  ;;  %v2553_v19 = vsub.f32 %v1767_v29, %v2319_v31 }
 0x36e   : > { %2023 = vrcp.f32 %v1052_v53 }
 0x36f   : > { %v2012_v58 = vpop.eup %2011  ;;  %v1705_v59 = vmul.f32 -1.442695, %v1024_v56 }
 0x370   : > { %v2014_v49 = vpop.eup %2013  ;;  %v1053_v21 = vadd.f32 1.0, %v2012_v58 }
 0x371   : > { %v1050_v42 = vadd.f32 1.0, %v2014_v49  ;;  %2025 = vpow2.f32 %v1705_v59  ;;  %v2751_v49 = vunpack.c.h.bf16 %v2297_v18 }
 0x372   : > { %2027 = vrcp.f32 %v1053_v21 }
 0x373   : > { %v2016_v43 = vpop.eup %2015  ;;  %2029 = vrcp.f32 %v1050_v42  ;;  %v2567_v21 = vsub.f32 %v2751_v49, %v2327_v35 }
 0x374   : > { %v2018_v60 = vpop.eup %2017  ;;  %v1075_v36 = vmul.f32 %v2016_v43, %v2524_v48 }
 0x375   : > { %v2020_v24 = vpop.eup %2019  ;;  %v1073_v32 = vmul.f32 %v2018_v60, %v2519_v5 }
 0x376   : > { %v1055_v44 = vadd.f32 1.0, %v2020_v24  ;;  %v1083_v15 = vadd.f32 %v2293_v16, %v1075_v36  ;;  %v580_v36 = vld [vmem:[%s2740_s13 + $0x8] sm:$0xff] }
 0x377   : > { %v2022_v7 = vpop.eup %2021  ;;  %v1081_v13 = vadd.f32 %v2285_v9, %v1073_v32  ;;  %v2000_v32 = vld [vmem:[%s2737_s10] sm:$0xff]  }
 0x378   : > { %v2024_v37 = vpop.eup %2023  ;;  %2031 = vrcp.f32 %v1055_v44  ;;  %v1054_v38 = vadd.f32 1.0, %v2022_v7  ;;  %v579_v44 = vld [vmem:[%s2740_s13] sm:$0xff]  ;;  %v581_v7 = vld [vmem:[%s2740_s13 + $0x10] sm:$0xff] }
 0x379   : > { %1292 = vadd.xlane.f32.xlu0 %v1081_v13  ;;  %v1076_v14 = vmul.f32 %v2024_v37, %v2530_v34  ;;  %v583_v37 = vld [vmem:[%s2740_s13 + $0x20] sm:$0xff] }
 0x37a   : > { %2033 = vrcp.f32 %v1054_v38  ;;  %v586_v38 = vld [vmem:[%s2740_s13 + $0x38] sm:$0xff] }
 0x37b   : > { %v2026_v6 = vpop.eup %2025  ;;  %v1084_v47 = vadd.f32 %v2295_v17, %v1076_v14  ;;  %v585_v14 = vld [vmem:[%s2740_s13 + $0x30] sm:$0xff] }
 0x37c   : > { %v2028_v3 = vpop.eup %2027  ;;  %v1056_v11 = vadd.f32 1.0, %v2026_v6  ;;  %v2001_v6 = vld [vmem:[%s2739_s12] sm:$0xff]  }
 0x37d   : > { %v2030_v30 = vpop.eup %2029  ;;  %1296 = vadd.xlane.f32.xlu0 %v1083_v15  ;;  %v1090_v51 = vpack.c.bf16 %v1084_v47, %v1083_v15  ;;  %v1077_v46 = vmul.f32 %v2028_v3, %v2545_v39  ;;  %1912 = vmatprep.mubr.msk.bf16.mxu0 %vm722_vm2, %v2001_v6  ;;  %v1096_v15 = vpop.permute.xlu0 %1095 }
 0x37e   : > { %2035 = vrcp.f32 %v1056_v11  ;;  %v1074_v4 = vmul.f32 %v2030_v30, %v2538_v45  ;;  %v1101_v3 = vpop.permute.xlu1 %1100 }
 0x37f   : > { %v1085_v58 = vadd.f32 %v2313_v26, %v1077_v46 }
 0x380   : > { %v1082_v8 = vadd.f32 %v2287_v10, %v1074_v4 }
 0x381   : > { %1298 = vadd.xlane.f32.xlu0 %v1084_v47 }
 0x382   : > { %v2032_v53 = vpop.eup %2031  ;;  %1294 = vadd.xlane.f32.xlu1 %v1082_v8  ;;  %v1089_v55 = vpack.c.bf16 %v1082_v8, %v1081_v13  ;;  %v582_v13 = vld [vmem:[%s2740_s13 + $0x18] sm:$0xff] }
 0x383   : > { %v1079_v59 = vmul.f32 %v2032_v53, %v2553_v19 }
 0x384   : > { %v2034_v56 = vpop.eup %2033  ;;  %1899 = vmatpush3.bf16.msra.mxu1 %v1089_v55 }
 0x385   : > { %1900 = vmatprep.subr.bf16.mxu1 %v2134_v2  ;;  %v1078_v29 = vmul.f32 %v2034_v56, %v2558_v22  ;;  %v1087_v42 = vadd.f32 %v2319_v31, %v1079_v59 }
 0x386   : > { %1300 = vadd.xlane.f32.xlu1 %v1085_v58 }
 0x387   : > { %v1086_v12 = vadd.f32 %v2315_v27, %v1078_v29 }
 0x388   : > { %v2036_v23 = vpop.eup %2035  ;;  %1901 = vmatpush3.bf16.msra.mxu1 %v1090_v51 }
 0x389   : > { %v1091_v43 = vpack.c.bf16 %v1086_v12, %v1085_v58  ;;  %1302 = vadd.xlane.f32.xlu0 %v1086_v12  ;;  %1902 = vmatprep.subr.bf16.mxu1 %v2134_v2  ;;  %v1080_v60 = vmul.f32 %v2036_v23, %v2567_v21  ;;  %v2002_v12 = vld [vmem:[%s2739_s12 + $0x8] sm:$0xff]  }
 0x38a   : > { %1304 = vadd.xlane.f32.xlu1 %v1087_v42 }
 0x38b   : > { %v1088_v24 = vadd.f32 %v2327_v35, %v1080_v60 }
 0x38c   : > { %1903 = vmatpush3.bf16.msra.mxu1 %v1091_v43 }
 0x38d   : > { %v1092_v18 = vpack.c.bf16 %v1088_v24, %v1087_v42  ;;  %1306 = vadd.xlane.f32.xlu0 %v1088_v24  ;;  %1904 = vmatprep.subr.bf16.mxu1 %v2134_v2  ;;  %v2003_v42 = vld [vmem:[%s2739_s12 + $0x10] sm:$0xff]  }
 0x390   : > { %1905 = vmatpush3.bf16.msra.mxu1 %v1092_v18 }
 0x393   : > { %1907 = vmatmul.mubr.msk.bf16.vlgmr.msra.gmra.mrb[20].mxu1 %vm614_vm1, %v2000_v32 }
 0x394   : > { %1938 = vmatprep.mubr.msk.bf16.mxu1 %vm722_vm2, %v2435_v62  ;;  %v584_v62 = vld [vmem:[%s2740_s13 + $0x28] sm:$0xff] }
 0x39b   : > { %1157 = vperm.xlu1 %1989, %v579_v44  }
 0x39f   : > { %1167 = vperm.xlu1 %1989, %v581_v7  }
 0x3a3   : > { %1172 = vperm.xlu1 %1989, %v582_v13   ;;  %1162 = vperm.xlu0 %1988, %v580_v36   ;;  %v2004_v36 = vld [vmem:[%s2739_s12 + $0x18] sm:$0xff]  }
 0x3a7   : > { %1182 = vperm.xlu1 %1989, %v584_v62   ;;  %1177 = vperm.xlu0 %1988, %v583_v37  }
 0x3ab   : > { %1192 = vperm.xlu1 %1989, %v586_v38   ;;  %1187 = vperm.xlu0 %1988, %v585_v14  }
 0x406   : > { %v1293_v47 = vpop.xlane.xlu0 %1292 }
 0x407   : > { %v1308_v23 = vmul.f32 0.015625, %v1293_v47 }
 0x40a   : > { %v1297_v30 = vpop.xlane.xlu0 %1296 }
 0x40b   : > { %v1310_v32 = vmul.f32 0.015625, %v1297_v30 }
 0x40e   : > { %v1299_v59 = vpop.xlane.xlu0 %1298 }
 0x40f   : > { %v1295_v55 = vpop.xlane.xlu1 %1294  ;;  %v1311_v24 = vmul.f32 0.015625, %v1299_v59 }
 0x410   : > { %v1309_v49 = vmul.f32 0.015625, %v1295_v55 }
 0x411   : > { %v1317_v44 = vpack.c.bf16 %v1311_v24, %v1310_v32 }
 0x412   : > { %v1316_v60 = vpack.c.bf16 %v1309_v49, %v1308_v23 }
 0x413   : > { %v1301_v18 = vpop.xlane.xlu1 %1300 }
 0x414   : > { %v1312_v62 = vmul.f32 0.015625, %v1301_v18 }
 0x416   : > { %v1303_v43 = vpop.xlane.xlu0 %1302 }
 0x417   : > { %v1313_v7 = vmul.f32 0.015625, %v1303_v43  ;;  %v1305_v37 = vpop.xlane.xlu1 %1304 }
 0x418   : > { %v1314_v6 = vmul.f32 0.015625, %v1305_v37 }
 0x419   : > { %v1318_v38 = vpack.c.bf16 %v1313_v7, %v1312_v62 }
 0x41a   : > { %v1307_v13 = vpop.xlane.xlu0 %1306 }
 0x41b   : > { %v1315_v14 = vmul.f32 0.015625, %v1307_v13  ;;  %v1158_v7 = vpop.permute.xlu1 %1157 }
 0x41f   : > { %v1168_v13 = vpop.permute.xlu1 %1167 }
 0x466   : > { %v1145_v11 = vpop.f32.mrb[20].mxu1 }
 0x467   : > { %v1146_v51 = vadd.f32 %v1145_v11, %v1096_v15  ;;  %v1908_v4 = vpop.f32.mrb[21].mxu1  ;;  %v1319_v15 = vpack.c.bf16 %v1315_v14, %v1314_v6 }
 0x468   : > { %v1148_v8 = vpop.f32.mrb[22].mxu1 }
 0x469   : > { %v1149_v46 = vadd.f32 %v1148_v8, %v1101_v3  ;;  %v1909_v53 = vpop.f32.mrb[23].mxu1  ;;  %v1152_v56 = vmax.f32 %v1146_v51, 0.0 }
 0x46b   : > { %v1153_v58 = vmax.f32 %v1149_v46, 0.0 }
 0x46d   : > { %v1154_v29 = vpack.c.bf16 %v1153_v58, %v1152_v56 }
 0x46f   : > { %1910 = vmatprep.subr.bf16.mxu0 %v1154_v29 }
 0x470   : > { %1911 = vmatpush3.bf16.msra.mxu0 %v1154_v29 }
 0x471   : > { %1920 = vmatprep.subr.bf16.mxu0 %v2134_v2 }
 0x473   : > { %1913 = vmatmul.mubr.msk.bf16.vlgmr.msra.gmra.mrb[4].mxu0 %vm722_vm2, %v2002_v12 }
 0x474   : > { %1921 = vmatpush3.bf16.msra.mxu0 %v1316_v60  ;;  %1916 = vmatprep.mubr.msk.bf16.mxu0 %vm722_vm2, %v2003_v42 }
 0x475   : > { %1922 = vmatprep.subr.bf16.mxu0 %v2134_v2 }
 0x478   : > { %1923 = vmatpush3.bf16.msra.mxu0 %v1317_v44 }
 0x479   : > { %1924 = vmatprep.subr.bf16.mxu0 %v2134_v2 }
 0x47b   : > { %1917 = vmatmul.mubr.msk.bf16.gmra.mrb[8].mxu0 %vm722_vm2, %v2004_v36  ;;  %v1173_v36 = vpop.permute.xlu1 %1172 }
 0x47c   : > { %1925 = vmatpush3.bf16.msra.mxu0 %v1318_v38  ;;  %1928 = vmatprep.mubr.msk.bf16.mxu0 %vm2135_vm0, %v2134_v2 }
 0x47d   : > { %1926 = vmatprep.subr.bf16.mxu0 %v2134_v2 }
 0x480   : > { %1927 = vmatpush3.bf16.msra.mxu0 %v1319_v15 }
 0x483   : > { %1929 = vmatmul.mubr.msk.bf16.vlgmr.msra.gmra.mrb[12].mxu0 %vm614_vm1, %v2388_v40 }
 0x484   : > { %1934 = vmatprep.mubr.msk.bf16.mxu0 %vm722_vm2, %v2395_v41 }
 0x546   : > { %v1914_v47 = vpop.f32.mrb[4].mxu0 }
 0x547   : > { %v1261_v3 = vpop.f32.mrb[5].mxu0 }
 0x548   : > { %v1915_v11 = vpop.f32.mrb[6].mxu0 }
 0x549   : > { %v1264_v30 = vpop.f32.mrb[7].mxu0  ;;  %v1273_v6 = vadd.f32 %v1915_v11, %v1173_v36 }
 0x54e   : > { %v2631_v51 = vpop.f32.mrb[8].mxu0 }
 0x54f   : > { %v2633_v4 = vpop.f32.mrb[9].mxu0 }
 0x550   : > { %v2635_v8 = vpop.f32.mrb[10].mxu0 }
 0x551   : > { %v2637_v46 = vpop.f32.mrb[11].mxu0 }
 0x556   : > { %v1354_v2 = vpop.f32.mrb[12].mxu0 }
 0x557   : > { %v1355_v53 = vadd.f32 %v1354_v2, %v2418_v50  ;;  %v1930_v55 = vpop.f32.mrb[13].mxu0  ;;  %v1262_v2 = vadd.f32 %v1261_v3, %v1158_v7 }
 0x558   : > { %v1357_v40 = vpop.f32.mrb[14].mxu0 }
 0x559   : > { %v1358_v56 = vadd.f32 %v1357_v40, %v2423_v52  ;;  %v1931_v41 = vpop.f32.mrb[15].mxu0  ;;  %v1361_v58 = vmax.f32 %v1355_v53, 0.0 }
 0x55b   : > { %v1362_v59 = vmax.f32 %v1358_v56, 0.0 }
 0x55d   : > { %v1363_v29 = vpack.c.bf16 %v1362_v59, %v1361_v58 }
 0x55f   : > { %1932 = vmatprep.subr.bf16.mxu0 %v1363_v29  ;;  %1942 = vmatprep.subr.bf16.mxu1 %v1363_v29 }
 0x560   : > { %1933 = vmatpush3.bf16.msra.mxu0 %v1363_v29  ;;  %1943 = vmatpush3.bf16.msra.mxu1 %v1363_v29 }
 0x563   : > { %1935 = vmatmul.mubr.msk.bf16.vlgmr.msra.gmra.mrb[16].mxu0 %vm722_vm2, %v2430_v61  ;;  %1939 = vmatmul.mubr.msk.bf16.vlgmr.msra.gmra.mrb[24].mxu1 %vm722_vm2, %v2445_v63 }
 0x636   : > { %v1936_v49 = vpop.f32.mrb[16].mxu0  ;;  %v1940_v50 = vpop.f32.mrb[24].mxu1 }
 0x637   : > { %v1407_v12 = vadd.f32 %v1936_v49, %v2454_v0  ;;  %v1398_v23 = vpop.f32.mrb[17].mxu0  ;;  %v1414_v52 = vpop.f32.mrb[25].mxu1  ;;  %v1423_v44 = vadd.f32 %v1940_v50, %v2482_v33 }
 0x638   : > { %v1937_v42 = vpop.f32.mrb[18].mxu0  ;;  %v1941_v43 = vpop.f32.mrb[26].mxu1  ;;  %v1399_v32 = vadd.f32 %v1398_v23, %v2459_v1  ;;  %v1415_v63 = vadd.f32 %v1414_v52, %v2477_v28  ;;  %v1270_v28 = vadd.f32 %v1914_v47, %v1168_v13 }
 0x639   : > { %v1410_v60 = vadd.f32 %v1937_v42, %v2466_v20  ;;  %1441 = vperm.xlu0 %1988, %v1407_v12   ;;  %v1401_v24 = vpop.f32.mrb[19].mxu0  ;;  %v1417_v18 = vpop.f32.mrb[27].mxu1  ;;  %v1426_v20 = vadd.f32 %v1941_v43, %v2502_v57 }
 0x63a   : > { %v1402_v61 = vadd.f32 %v1401_v24, %v2472_v25  ;;  %v1418_v0 = vadd.f32 %v1417_v18, %v2493_v54  ;;  %v1163_v1 = vpop.permute.xlu0 %1162  ;;  %v1183_v25 = vpop.permute.xlu1 %1182 }
 0x63b   : > { %1446 = vperm.xlu1 %1989, %v1410_v60   ;;  %v1265_v57 = vadd.f32 %v1264_v30, %v1163_v1  ;;  %v1281_v47 = vadd.f32 %v2637_v46, %v1183_v25 }
 0x63d   : > { %1431 = vperm.xlu0 %1988, %v1399_v32  }
 0x63e   : > { %v1178_v62 = vpop.permute.xlu0 %1177  ;;  %v1193_v38 = vpop.permute.xlu1 %1192 }
 0x63f   : > { %1436 = vperm.xlu1 %1989, %v1402_v61   ;;  %v1278_v58 = vadd.f32 %v2633_v4, %v1178_v62  ;;  %v1289_v42 = vadd.f32 %v2635_v8, %v1193_v38 }
 0x641   : > { %1451 = vperm.xlu0 %1988, %v1415_v63  }
 0x642   : > { %v1188_v37 = vpop.permute.xlu0 %1187 }
 0x643   : > { %1456 = vperm.xlu1 %1989, %v1418_v0   ;;  %v1286_v12 = vadd.f32 %v2631_v51, %v1188_v37 }
 0x645   : > { %1461 = vperm.xlu0 %1988, %v1423_v44  }
 0x647   : > { %1466 = vperm.xlu1 %1989, %v1426_v20  }
 0x6b8   : > { %v1442_v14 = vpop.permute.xlu0 %1441 }
 0x6b9   : > { %v1471_v54 = vadd.f32 %v1442_v14, %v1270_v28 }
 0x6ba   : > { %v1447_v15 = vpop.permute.xlu1 %1446 }
 0x6bb   : > { %v1723_v33 = vmul.f32 -1.442695, %v1471_v54  ;;  %v1472_v53 = vadd.f32 %v1447_v15, %v1273_v6 }
 0x6bc   : > { %v1432_v55 = vpop.permute.xlu0 %1431 }
 0x6bd   : > { %2037 = vpow2.f32 %v1723_v33  ;;  %v1724_v40 = vmul.f32 -1.442695, %v1472_v53  ;;  %v1469_v56 = vadd.f32 %v1432_v55, %v1262_v2 }
 0x6be   : > { %v1437_v41 = vpop.permute.xlu1 %1436 }
 0x6bf   : > { %2039 = vpow2.f32 %v1724_v40  ;;  %v1721_v59 = vmul.f32 -1.442695, %v1469_v56  ;;  %v1470_v29 = vadd.f32 %v1437_v41, %v1265_v57 }
 0x6c0   : > { %v1452_v49 = vpop.permute.xlu0 %1451 }
 0x6c1   : > { %2041 = vpow2.f32 %v1721_v59  ;;  %v1722_v11 = vmul.f32 -1.442695, %v1470_v29  ;;  %v1473_v50 = vadd.f32 %v1452_v49, %v1278_v58 }
 0x6c2   : > { %v1457_v3 = vpop.permute.xlu1 %1456 }
 0x6c3   : > { %2043 = vpow2.f32 %v1722_v11  ;;  %v1725_v30 = vmul.f32 -1.442695, %v1473_v50  ;;  %v1474_v23 = vadd.f32 %v1457_v3, %v1281_v47 }
 0x6c4   : > { %v1462_v52 = vpop.permute.xlu0 %1461 }
 0x6c5   : > { %2045 = vpow2.f32 %v1725_v30  ;;  %v1726_v4 = vmul.f32 -1.442695, %v1474_v23  ;;  %v1475_v43 = vadd.f32 %v1462_v52, %v1286_v12 }
 0x6c6   : > { %v1467_v60 = vpop.permute.xlu1 %1466 }
 0x6c7   : > { %v2038_v24 = vpop.eup %2037  ;;  %2047 = vpow2.f32 %v1726_v4  ;;  %v1727_v18 = vmul.f32 -1.442695, %v1475_v43  ;;  %v1476_v46 = vadd.f32 %v1467_v60, %v1289_v42 }
 0x6c8   : > { %v1503_v32 = vadd.f32 1.0, %v2038_v24 }
 0x6c9   : > { %v2040_v61 = vpop.eup %2039  ;;  %2049 = vpow2.f32 %v1727_v18  ;;  %v1728_v63 = vmul.f32 -1.442695, %v1476_v46 }
 0x6ca   : > { %2051 = vrcp.f32 %v1503_v32  ;;  %v1504_v51 = vadd.f32 1.0, %v2040_v61 }
 0x6cb   : > { %v2042_v0 = vpop.eup %2041  ;;  %2053 = vpow2.f32 %v1728_v63 }
 0x6cc   : > { %2055 = vrcp.f32 %v1504_v51  ;;  %v1501_v44 = vadd.f32 1.0, %v2042_v0 }
 0x6cd   : > { %v2044_v8 = vpop.eup %2043 }
 0x6ce   : > { %2057 = vrcp.f32 %v1501_v44  ;;  %v1502_v20 = vadd.f32 1.0, %v2044_v8 }
 0x6cf   : > { %v2046_v7 = vpop.eup %2045 }
 0x6d0   : > { %2059 = vrcp.f32 %v1502_v20  ;;  %v1505_v13 = vadd.f32 1.0, %v2046_v7 }
 0x6d1   : > { %v2048_v1 = vpop.eup %2047 }
 0x6d2   : > { %2061 = vrcp.f32 %v1505_v13  ;;  %v1506_v36 = vadd.f32 1.0, %v2048_v1 }
 0x6d3   : > { %v2050_v62 = vpop.eup %2049 }
 0x6d4   : > { %v2052_v25 = vpop.eup %2051  ;;  %2063 = vrcp.f32 %v1506_v36  ;;  %v1507_v37 = vadd.f32 1.0, %v2050_v62 }
 0x6d5   : > { %v2054_v38 = vpop.eup %2053  ;;  %v1527_v28 = vmul.f32 %v2052_v25, %v2524_v48 }
 0x6d6   : > { %v2056_v14 = vpop.eup %2055  ;;  %2065 = vrcp.f32 %v1507_v37  ;;  %v1508_v6 = vadd.f32 1.0, %v2054_v38 }
 0x6d7   : > { %v1528_v54 = vmul.f32 %v2056_v14, %v2530_v34  ;;  %v1535_v2 = vadd.f32 %v2293_v16, %v1527_v28 }
 0x6d8   : > { %v2058_v15 = vpop.eup %2057  ;;  %2067 = vrcp.f32 %v1508_v6 }
 0x6d9   : > { %v1536_v33 = vadd.f32 %v2295_v17, %v1528_v54  ;;  %v1525_v53 = vmul.f32 %v2058_v15, %v2519_v5 }
 0x6da   : > { %v2060_v55 = vpop.eup %2059 }
 0x6db   : > { %v1793_v57 = vpack.c.bf16 %v1536_v33, %v1535_v2  ;;  %v1526_v40 = vmul.f32 %v2060_v55, %v2538_v45  ;;  %v1533_v56 = vadd.f32 %v2285_v9, %v1525_v53 }
 0x6dc   : > { %v2062_v48 = vpop.eup %2061 }
 0x6dd   : > { %v1534_v34 = vadd.f32 %v2287_v10, %v1526_v40  ;;  %v1529_v41 = vmul.f32 %v2062_v48, %v2545_v39  ;;  %1811 = vst [vmem:[%s475_s25 + $0x8] sm:$0xff] %v1793_v57  }
 0x6de   : > { %v2064_v58 = vpop.eup %2063 }
 0x6df   : > { %v1788_v16 = vpack.c.bf16 %v1534_v34, %v1533_v56  ;;  %v1530_v17 = vmul.f32 %v2064_v58, %v2558_v22  ;;  %v1537_v5 = vadd.f32 %v2313_v26, %v1529_v41 }
 0x6e0   : > { %v2066_v59 = vpop.eup %2065 }
 0x6e1   : > { %v1538_v45 = vadd.f32 %v2315_v27, %v1530_v17  ;;  %v1531_v29 = vmul.f32 %v2066_v59, %v2553_v19  ;;  %1789 = vst [vmem:[%s475_s25] sm:$0xff] %v1788_v16  }
 0x6e2   : > { %v2068_v9 = vpop.eup %2067 }
 0x6e3   : > { %v1798_v10 = vpack.c.bf16 %v1538_v45, %v1537_v5  ;;  %v1532_v39 = vmul.f32 %v2068_v9, %v2567_v21  ;;  %v1539_v49 = vadd.f32 %v2319_v31, %v1531_v29 }
 0x6e5   : > { %v1540_v22 = vadd.f32 %v2327_v35, %v1532_v39  ;;  %1812 = vst [vmem:[%s475_s25 + $0x10] sm:$0xff] %v1798_v10  }
 0x6e7   : > { %v1803_v26 = vpack.c.bf16 %v1540_v22, %v1539_v49 }
 0x6e9   : > { %1813 = vst [vmem:[%s475_s25 + $0x18] sm:$0xff] %v1803_v26  }
 0x6ea   : > { %2082 = shalt.err (!%p2079_p3)
}
 0x6eb   : > { %s2083_s20 = scalar_lea.hbm %s2680_s27, 512  ;;  %s2087_s22 = scalar_lea.hbm %s2741_s14, 1024 }
 0x6ec   : > { %p2084_p4 = scmp.ne.s32.totalorder %s2680_s27, %s2083_s20  ;;  %p2088_p9 = scmp.lt.u32.totalorder %s2680_s27, %s2741_s14 }
 0x6ed   : > { %p2089_p10 = scmp.lt.u32.totalorder %s2087_s22, %s2083_s20  ;;  %p2091_p12 = scmp.lt.u32.totalorder %s2083_s20, %s2680_s27 }
 0x6ee   : > { %p2085_p7 = pnand %p2084_p4, %p2252_p5 }
 0x6ef   : > { %p2090_p11 = por %p2089_p10, %p2088_p9 }
 0x6f0   : > { %p2086_p8 = pneg %p2085_p7 }
 0x6f1   : > { %p2092_p13 = por %p2091_p12, %p2090_p11 }
 0x6f3   : > { %p2093_p0 = pnand %p2092_p13, %p2086_p8 }
 0x6f5   : > { %2096 = shalt.err (!%p2093_p0)
}
 0x6f6   : > { %s2137_s28 = smov 64   ;;  %s2138_s26 = smov 4  }
 0x6f7   : > { %1944 = dma.vmem_to_hbm [thread:$0]  (%p2252_p5), %s2682_s15, 512, %s2680_s27, %s2686_s17, %s2137_s28, %s2137_s28, %s2138_s26  }
 0x6f8 PF: > { %p1950_p1 = scmp.ge.s32.totalorder %s2131_s16, 2  ;;  %s1610_s25 = sand.u32 1, %s2119_s29  }
 0x6f9   : > { %s1611_s20 = scalar_lea.sflag [#allocation3], %s1610_s25 }
 0x6fa   : > { %p1947_p2 = pnand %p1950_p1, %p2256_p6 }
 0x6fc   : > { %2114 = dma.done.wait (!%p1947_p2), %s1611_s20, 512  }
 0x6fd   : > { %2116 = vsyncadd (!%p1947_p2), %s1611_s20, 4294966784  ;;  %s2752_s16 = sld [smem:[#allocation6_spill]]  ;;  %s2753_s19 = sld [smem:[#allocation5_spill]] }
 0x6fe   : > { %s2754_s15 = sld [smem:[#allocation7_spill]]  ;;  %s2755_s29 = smov %s2123_s30 }
 0x703   : > { %p24_p3 = scmp.ge.s32.totalorder %s2752_s16, 4   ;;  %s2756_s30 = smov %s2753_s19 }
 0x705   :  { %26 = sbr.rel (!%p24_p3) target bundleno = 3 (0x3), region = 114 }
 0x70c   :  { %1616 = vsyncpa [#allocation3], 1 }
 0x70d   :  { %1618 = vsyncpa [#allocation3 + $0x1], 1 }

</bundles_post_ra>
